<compile_context>
chip_gen: v7x
topology: tpu7x:2x2x1
jax: 0.10.0
libtpu: 0.0.40
codegen_flags: <defaults>
</compile_context>

<pallas_src>
import functools

import jax
import jax.numpy as jnp
from jax.experimental import pallas as pl
from jax.experimental.pallas import tpu as pltpu

LEAKY_SLOPE = 0.01  # nn.LeakyReLU(inplace=True) default negative_slope


def _round_up(x, m):
    return (x + m - 1) // m * m


def _tpu_generation():
    try:
        kind = jax.devices()[0].device_kind.lower()
    except Exception:
        return None
    for g in ("v7", "v6", "v5"):
        if g in kind:
            return g
    return None


# -----------------------------------------------------------------------------
# Pallas kernel: conv as kh*kw in-kernel taps -> MXU matmuls, fused bias+LReLU
# -----------------------------------------------------------------------------

def _conv_taps_kernel(x_ref, w_ref, b_ref, o_ref, *, kh, kw, stride, Ho, Wo,
                      Hs, Cin_p, slope):
    """x_ref: (s*s*Hs, Ws, Cin_p) bf16 phase-split activation block (resident).
    w_ref: (kh*kw*Cin_p, TN) bf16 weight panel.  b_ref: (1, TN) f32 bias.
    o_ref: (Ho*Wo, TN) f32 output tile (lane-dense store)."""
    s = stride
    M = Ho * Wo
    TN = o_ref.shape[-1]
    acc = jnp.zeros((M, TN), jnp.float32)
    # kh*kw is small (e.g. 9): statically unrolled tap loop, one small MXU
    # matmul per tap, f32 accumulation held locally (no scratch, no @pl.when).
    for i in range(kh):
        for j in range(kw):
            phase = (i % s) * s + (j % s)          # which stride phase
            di, dj = i // s, j // s                # offset within the phase
            r0 = phase * Hs + di
            a = x_ref[r0:r0 + Ho, dj:dj + Wo, :].reshape(M, Cin_p)
            kt = i * kw + j
            wt = w_ref[kt * Cin_p:(kt + 1) * Cin_p, :]
            acc = acc + jnp.dot(a, wt, preferred_element_type=jnp.float32)
    y = acc + b_ref[...]
    o_ref[...] = jnp.maximum(y, slope * y).astype(o_ref.dtype)


# -----------------------------------------------------------------------------
# LeakyReLUConv2d forward (ReflectionPad2d(padding) -> Conv2d -> LeakyReLU)
# -----------------------------------------------------------------------------

def leaky_relu_conv2d_forward(params, x, *, stride, padding,
                              slope=LEAKY_SLOPE):
    """x: (B, Cin, H, W) NCHW (PyTorch convention). Returns NCHW output."""
    w = params["w"]                                # (Cout, Cin, kh, kw)
    bias = params["b"]                             # (Cout,)
    Cout, Cin, kh, kw = w.shape
    s = int(stride)
    B = x.shape[0]

    # ---- single layout pre-pass over the input (XLA-fusible, no im2col) ----
    x = jnp.transpose(x, (0, 2, 3, 1))             # NCHW -> NHWC (lane = Cin)
    if padding > 0:
        x = jnp.pad(x, ((0, 0), (padding, padding), (padding, padding), (0, 0)),
                    mode="reflect")                # ReflectionPad2d
    Hp, Wp = x.shape[1], x.shape[2]
    Ho = (Hp - kh) // s + 1
    Wo = (Wp - kw) // s + 1
    Hs = Ho + (kh - 1) // s                        # phase rows needed per phase
    Ws = Wo + (kw - 1) // s
    Hn = (Ho - 1) * s + kh                         # rows actually read by conv
    Wn = (Wo - 1) * s + kw
    Cin_p = _round_up(Cin, 8)                      # sublane-aligned contraction

    x = x[:, :Hn, :Wn, :]
    x = jnp.pad(x, ((0, 0), (0, s * Hs - Hn), (0, s * Ws - Wn),
                    (0, Cin_p - Cin)))
    # space-to-depth: phase (pi, pj)[hs, ws] == x_pad[hs*s + pi, ws*s + pj]
    x = x.reshape(B, Hs, s, Ws, s, Cin_p).transpose(0, 2, 4, 1, 3, 5)
    x = x.reshape(B, s * s * Hs, Ws, Cin_p).astype(jnp.bfloat16)

    # ---- weights / bias (tiny, one-time) ----
    gen = _tpu_generation()
    # 256-wide N alignment for v6e/v7x 2x256x256 MXUs, but only when Cout is
    # large enough for it to matter (avoid 8x writeback waste on tiny Cout).
    lane_align = 256 if (gen in ("v6", "v7") and Cout > 128) else 128
    Cout_p = _round_up(Cout, lane_align)
    TN = next(t for t in (512, 384, 256, 128) if Cout_p % t == 0)

    wmat = jnp.transpose(w, (2, 3, 1, 0))          # (kh, kw, Cin, Cout)
    wmat = jnp.pad(wmat, ((0, 0), (0, 0), (0, Cin_p - Cin), (0, Cout_p - Cout)))
    wmat = wmat.reshape(kh * kw * Cin_p, Cout_p).astype(jnp.bfloat16)
    bias_p = jnp.pad(bias, (0, Cout_p - Cout)).reshape(1, Cout_p).astype(
        jnp.float32)

    M = Ho * Wo
    grid = (B, Cout_p // TN)   # both parallel: B>=2 gives both v7x TCs work

    # VMEM budget: activation block is resident across the Cout axis; double-
    # buffered across batch.  Cap well below v7x's 64 MiB physical VMEM.
    est = (2 * (s * s * Hs) * Ws * Cin_p * 2       # bf16 activation block
           + 2 * kh * kw * Cin_p * TN * 2          # bf16 weight panel
           + 2 * TN * 4                            # bias
           + 2 * M * TN * 4                        # f32 output block
           + M * TN * 4)                           # f32 accumulator
    vmem_limit = int(max(16 << 20, min(est + (4 << 20), 48 << 20)))
    vmem_limit = max(vmem_limit, est + (2 << 20))  # never under-provision

    # TODO(synk): for very large spatial extents (activation block or M*TN
    # accumulator approaching VMEM), add an output-row-tile grid axis with a
    # small duplicated halo in the pre-pass.
    kern = functools.partial(_conv_taps_kernel, kh=kh, kw=kw, stride=s,
                             Ho=Ho, Wo=Wo, Hs=Hs, Cin_p=Cin_p, slope=slope)
    out = pl.pallas_call(
        kern,
        out_shape=jax.ShapeDtypeStruct((B, M, Cout_p), jnp.float32),
        grid=grid,
        in_specs=[
            pl.BlockSpec((None, s * s * Hs, Ws, Cin_p),
                         lambda b, n: (b, 0, 0, 0)),
            pl.BlockSpec((kh * kw * Cin_p, TN), lambda b, n: (0, n)),
            pl.BlockSpec((1, TN), lambda b, n: (0, n)),
        ],
        out_specs=pl.BlockSpec((None, M, TN), lambda b, n: (b, 0, n)),
        compiler_params=pltpu.CompilerParams(
            dimension_semantics=("parallel", "parallel"),
            vmem_limit_bytes=vmem_limit,
        ),
    )(x, wmat, bias_p)

    out = out[:, :, :Cout].reshape(B, Ho, Wo, Cout)
    return jnp.transpose(out, (0, 3, 1, 2))        # back to NCHW (module API)


# Pure-JAX reference (correctness check only).
def reference_forward(params, x, *, stride, padding, slope=LEAKY_SLOPE):
    w = params["w"]
    b = params["b"]
    if padding > 0:
        x = jnp.pad(x, ((0, 0), (0, 0), (padding, padding), (padding, padding)),
                    mode="reflect")
    y = jax.lax.conv_general_dilated(
        x, w, window_strides=(stride, stride), padding="VALID",
        dimension_numbers=("NCHW", "OIHW", "NCHW"))
    y = y + b.reshape(1, -1, 1, 1)
    return jnp.where(y >= 0, y, slope * y)


# -----------------------------------------------------------------------------
# Main
# -----------------------------------------------------------------------------

if __name__ == "__main__":
    key = jax.random.PRNGKey(0)
    kw_, kb_, kx_ = jax.random.split(key, 3)

    # Small shapes consistent with the module: n_in=4, n_out=32, k=3, s=2, p=1.
    B, Cin, H, W = 2, 4, 16, 16
    Cout, ksz, stride, padding = 32, 3, 2, 1

    # gaussian_weights_init: weight ~ N(0, 0.02); bias small random.
    params = {
        "w": 0.02 * jax.random.normal(kw_, (Cout, Cin, ksz, ksz), jnp.float32),
        "b": 0.1 * jax.random.normal(kb_, (Cout,), jnp.float32),
    }
    # TODO(synk): sn=True (spectral norm) is training-time weight preprocessing
    # (power iteration on the reshaped weight matrix); sn=False default here.
    x = jax.random.normal(kx_, (B, Cin, H, W), jnp.float32)

    fwd = jax.jit(functools.partial(leaky_relu_conv2d_forward,
                                    stride=stride, padding=padding))
    y = fwd(params, x)
    jax.block_until_ready(y)

    Ho = (H + 2 * padding - ksz) // stride + 1
    Wo = (W + 2 * padding - ksz) // stride + 1
    assert y.shape == (B, Cout, Ho, Wo), y.shape
    assert bool(jnp.all(jnp.isfinite(y)))

    y_ref = reference_forward(params, x, stride=stride, padding=padding)
    max_err = float(jnp.max(jnp.abs(y - y_ref)))
    assert jnp.allclose(y, y_ref, atol=5e-2, rtol=5e-2), max_err

    print("KERNEL_OK")
</pallas_src>

<mosaic_0001>
module attributes {stable_mosaic.version = 11 : i64} {
  func.func @_conv_taps_kernel(%arg0: i32, %arg1: i32, %arg2: memref<1x36x9x8xbf16, #tpu.memory_space<vmem>>, %arg3: memref<72x128xbf16, #tpu.memory_space<vmem>>, %arg4: memref<1x128xf32, #tpu.memory_space<vmem>>, %arg5: memref<1x64x128xf32, #tpu.memory_space<vmem>>) attributes {dimension_semantics = [#tpu.dimension_semantics<parallel>, #tpu.dimension_semantics<parallel>], iteration_bounds = array<i64: 2, 1>, scalar_prefetch = 0 : i64, scratch_operands = 0 : i64, tpu.core_type = #tpu.core_type<tc>, window_params = [{transform_indices = @transform_0, window_bounds = array<i64: 1, 36, 9, 8>}, {transform_indices = @transform_1, window_bounds = array<i64: 72, 128>}, {transform_indices = @transform_2, window_bounds = array<i64: 1, 128>}, {transform_indices = @transform_3, window_bounds = array<i64: 1, 64, 128>}]} {
    %cst = arith.constant 0.000000e+00 : f32
    %0 = vector.broadcast %cst : f32 to vector<64x128xf32>
    %c0 = arith.constant 0 : index
    %c0_0 = arith.constant 0 : index
    %c0_1 = arith.constant 0 : index
    %c0_2 = arith.constant 0 : index
    %1 = vector.load %arg2[%c0, %c0_0, %c0_1, %c0_2] : memref<1x36x9x8xbf16, #tpu.memory_space<vmem>>, vector<1x8x8x8xbf16>
    %2 = vector.shape_cast %1 : vector<1x8x8x8xbf16> to vector<8x8x8xbf16>
    %3 = vector.shape_cast %2 : vector<8x8x8xbf16> to vector<64x8xbf16>
    %c0_3 = arith.constant 0 : index
    %c0_4 = arith.constant 0 : index
    %4 = vector.load %arg3[%c0_3, %c0_4] : memref<72x128xbf16, #tpu.memory_space<vmem>>, vector<8x128xbf16>
    %cst_5 = arith.constant dense<0.000000e+00> : vector<64x128xf32>
    %5 = tpu.matmul %3, %4, %cst_5 {dimension_numbers = #tpu.dot_dimension_numbers<[1], [0], [0], [1], [0, 0, 1, 1], [], []>} : vector<64x8xbf16>, vector<8x128xbf16>, vector<64x128xf32> -> vector<64x128xf32>
    %6 = arith.addf %0, %5 : vector<64x128xf32>
    %c0_6 = arith.constant 0 : index
    %c9 = arith.constant 9 : index
    %c0_7 = arith.constant 0 : index
    %c0_8 = arith.constant 0 : index
    %7 = vector.load %arg2[%c0_6, %c9, %c0_7, %c0_8] : memref<1x36x9x8xbf16, #tpu.memory_space<vmem>>, vector<1x8x8x8xbf16>
    %8 = vector.shape_cast %7 : vector<1x8x8x8xbf16> to vector<8x8x8xbf16>
    %9 = vector.shape_cast %8 : vector<8x8x8xbf16> to vector<64x8xbf16>
    %c8 = arith.constant 8 : index
    %c0_9 = arith.constant 0 : index
    %10 = vector.load %arg3[%c8, %c0_9] : memref<72x128xbf16, #tpu.memory_space<vmem>>, vector<8x128xbf16>
    %cst_10 = arith.constant dense<0.000000e+00> : vector<64x128xf32>
    %11 = tpu.matmul %9, %10, %cst_10 {dimension_numbers = #tpu.dot_dimension_numbers<[1], [0], [0], [1], [0, 0, 1, 1], [], []>} : vector<64x8xbf16>, vector<8x128xbf16>, vector<64x128xf32> -> vector<64x128xf32>
    %12 = arith.addf %6, %11 : vector<64x128xf32>
    %c0_11 = arith.constant 0 : index
    %c0_12 = arith.constant 0 : index
    %c1 = arith.constant 1 : index
    %c0_13 = arith.constant 0 : index
    %13 = vector.load %arg2[%c0_11, %c0_12, %c1, %c0_13] : memref<1x36x9x8xbf16, #tpu.memory_space<vmem>>, vector<1x8x8x8xbf16>
    %14 = vector.shape_cast %13 : vector<1x8x8x8xbf16> to vector<8x8x8xbf16>
    %15 = vector.shape_cast %14 : vector<8x8x8xbf16> to vector<64x8xbf16>
    %c16 = arith.constant 16 : index
    %c0_14 = arith.constant 0 : index
    %16 = vector.load %arg3[%c16, %c0_14] : memref<72x128xbf16, #tpu.memory_space<vmem>>, vector<8x128xbf16>
    %cst_15 = arith.constant dense<0.000000e+00> : vector<64x128xf32>
    %17 = tpu.matmul %15, %16, %cst_15 {dimension_numbers = #tpu.dot_dimension_numbers<[1], [0], [0], [1], [0, 0, 1, 1], [], []>} : vector<64x8xbf16>, vector<8x128xbf16>, vector<64x128xf32> -> vector<64x128xf32>
    %18 = arith.addf %12, %17 : vector<64x128xf32>
    %c0_16 = arith.constant 0 : index
    %c18 = arith.constant 18 : index
    %c0_17 = arith.constant 0 : index
    %c0_18 = arith.constant 0 : index
    %19 = vector.load %arg2[%c0_16, %c18, %c0_17, %c0_18] : memref<1x36x9x8xbf16, #tpu.memory_space<vmem>>, vector<1x8x8x8xbf16>
    %20 = vector.shape_cast %19 : vector<1x8x8x8xbf16> to vector<8x8x8xbf16>
    %21 = vector.shape_cast %20 : vector<8x8x8xbf16> to vector<64x8xbf16>
    %c24 = arith.constant 24 : index
    %c0_19 = arith.constant 0 : index
    %22 = vector.load %arg3[%c24, %c0_19] : memref<72x128xbf16, #tpu.memory_space<vmem>>, vector<8x128xbf16>
    %cst_20 = arith.constant dense<0.000000e+00> : vector<64x128xf32>
    %23 = tpu.matmul %21, %22, %cst_20 {dimension_numbers = #tpu.dot_dimension_numbers<[1], [0], [0], [1], [0, 0, 1, 1], [], []>} : vector<64x8xbf16>, vector<8x128xbf16>, vector<64x128xf32> -> vector<64x128xf32>
    %24 = arith.addf %18, %23 : vector<64x128xf32>
    %c0_21 = arith.constant 0 : index
    %c27 = arith.constant 27 : index
    %c0_22 = arith.constant 0 : index
    %c0_23 = arith.constant 0 : index
    %25 = vector.load %arg2[%c0_21, %c27, %c0_22, %c0_23] : memref<1x36x9x8xbf16, #tpu.memory_space<vmem>>, vector<1x8x8x8xbf16>
    %26 = vector.shape_cast %25 : vector<1x8x8x8xbf16> to vector<8x8x8xbf16>
    %27 = vector.shape_cast %26 : vector<8x8x8xbf16> to vector<64x8xbf16>
    %c32 = arith.constant 32 : index
    %c0_24 = arith.constant 0 : index
    %28 = vector.load %arg3[%c32, %c0_24] : memref<72x128xbf16, #tpu.memory_space<vmem>>, vector<8x128xbf16>
    %cst_25 = arith.constant dense<0.000000e+00> : vector<64x128xf32>
    %29 = tpu.matmul %27, %28, %cst_25 {dimension_numbers = #tpu.dot_dimension_numbers<[1], [0], [0], [1], [0, 0, 1, 1], [], []>} : vector<64x8xbf16>, vector<8x128xbf16>, vector<64x128xf32> -> vector<64x128xf32>
    %30 = arith.addf %24, %29 : vector<64x128xf32>
    %c0_26 = arith.constant 0 : index
    %c18_27 = arith.constant 18 : index
    %c1_28 = arith.constant 1 : index
    %c0_29 = arith.constant 0 : index
    %31 = vector.load %arg2[%c0_26, %c18_27, %c1_28, %c0_29] : memref<1x36x9x8xbf16, #tpu.memory_space<vmem>>, vector<1x8x8x8xbf16>
    %32 = vector.shape_cast %31 : vector<1x8x8x8xbf16> to vector<8x8x8xbf16>
    %33 = vector.shape_cast %32 : vector<8x8x8xbf16> to vector<64x8xbf16>
    %c40 = arith.constant 40 : index
    %c0_30 = arith.constant 0 : index
    %34 = vector.load %arg3[%c40, %c0_30] : memref<72x128xbf16, #tpu.memory_space<vmem>>, vector<8x128xbf16>
    %cst_31 = arith.constant dense<0.000000e+00> : vector<64x128xf32>
    %35 = tpu.matmul %33, %34, %cst_31 {dimension_numbers = #tpu.dot_dimension_numbers<[1], [0], [0], [1], [0, 0, 1, 1], [], []>} : vector<64x8xbf16>, vector<8x128xbf16>, vector<64x128xf32> -> vector<64x128xf32>
    %36 = arith.addf %30, %35 : vector<64x128xf32>
    %c0_32 = arith.constant 0 : index
    %c1_33 = arith.constant 1 : index
    %c0_34 = arith.constant 0 : index
    %c0_35 = arith.constant 0 : index
    %37 = vector.load %arg2[%c0_32, %c1_33, %c0_34, %c0_35] : memref<1x36x9x8xbf16, #tpu.memory_space<vmem>>, vector<1x8x8x8xbf16>
    %38 = vector.shape_cast %37 : vector<1x8x8x8xbf16> to vector<8x8x8xbf16>
    %39 = vector.shape_cast %38 : vector<8x8x8xbf16> to vector<64x8xbf16>
    %c48 = arith.constant 48 : index
    %c0_36 = arith.constant 0 : index
    %40 = vector.load %arg3[%c48, %c0_36] : memref<72x128xbf16, #tpu.memory_space<vmem>>, vector<8x128xbf16>
    %cst_37 = arith.constant dense<0.000000e+00> : vector<64x128xf32>
    %41 = tpu.matmul %39, %40, %cst_37 {dimension_numbers = #tpu.dot_dimension_numbers<[1], [0], [0], [1], [0, 0, 1, 1], [], []>} : vector<64x8xbf16>, vector<8x128xbf16>, vector<64x128xf32> -> vector<64x128xf32>
    %42 = arith.addf %36, %41 : vector<64x128xf32>
    %c0_38 = arith.constant 0 : index
    %c10 = arith.constant 10 : index
    %c0_39 = arith.constant 0 : index
    %c0_40 = arith.constant 0 : index
    %43 = vector.load %arg2[%c0_38, %c10, %c0_39, %c0_40] : memref<1x36x9x8xbf16, #tpu.memory_space<vmem>>, vector<1x8x8x8xbf16>
    %44 = vector.shape_cast %43 : vector<1x8x8x8xbf16> to vector<8x8x8xbf16>
    %45 = vector.shape_cast %44 : vector<8x8x8xbf16> to vector<64x8xbf16>
    %c56 = arith.constant 56 : index
    %c0_41 = arith.constant 0 : index
    %46 = vector.load %arg3[%c56, %c0_41] : memref<72x128xbf16, #tpu.memory_space<vmem>>, vector<8x128xbf16>
    %cst_42 = arith.constant dense<0.000000e+00> : vector<64x128xf32>
    %47 = tpu.matmul %45, %46, %cst_42 {dimension_numbers = #tpu.dot_dimension_numbers<[1], [0], [0], [1], [0, 0, 1, 1], [], []>} : vector<64x8xbf16>, vector<8x128xbf16>, vector<64x128xf32> -> vector<64x128xf32>
    %48 = arith.addf %42, %47 : vector<64x128xf32>
    %c0_43 = arith.constant 0 : index
    %c1_44 = arith.constant 1 : index
    %c1_45 = arith.constant 1 : index
    %c0_46 = arith.constant 0 : index
    %49 = vector.load %arg2[%c0_43, %c1_44, %c1_45, %c0_46] : memref<1x36x9x8xbf16, #tpu.memory_space<vmem>>, vector<1x8x8x8xbf16>
    %50 = vector.shape_cast %49 : vector<1x8x8x8xbf16> to vector<8x8x8xbf16>
    %51 = vector.shape_cast %50 : vector<8x8x8xbf16> to vector<64x8xbf16>
    %c64 = arith.constant 64 : index
    %c0_47 = arith.constant 0 : index
    %52 = vector.load %arg3[%c64, %c0_47] : memref<72x128xbf16, #tpu.memory_space<vmem>>, vector<8x128xbf16>
    %cst_48 = arith.constant dense<0.000000e+00> : vector<64x128xf32>
    %53 = tpu.matmul %51, %52, %cst_48 {dimension_numbers = #tpu.dot_dimension_numbers<[1], [0], [0], [1], [0, 0, 1, 1], [], []>} : vector<64x8xbf16>, vector<8x128xbf16>, vector<64x128xf32> -> vector<64x128xf32>
    %54 = arith.addf %48, %53 : vector<64x128xf32>
    %c0_49 = arith.constant 0 : index
    %c0_50 = arith.constant 0 : index
    %55 = vector.load %arg4[%c0_49, %c0_50] : memref<1x128xf32, #tpu.memory_space<vmem>>, vector<1x128xf32>
    %56 = vector.broadcast %55 : vector<1x128xf32> to vector<64x128xf32>
    %57 = arith.addf %54, %56 : vector<64x128xf32>
    %cst_51 = arith.constant 0.00999999977 : f32
    %58 = vector.broadcast %cst_51 : f32 to vector<64x128xf32>
    %59 = arith.mulf %58, %57 : vector<64x128xf32>
    %60 = arith.maximumf %57, %59 : vector<64x128xf32>
    %c0_52 = arith.constant 0 : index
    %c0_53 = arith.constant 0 : index
    %c0_54 = arith.constant 0 : index
    %61 = vector.load %arg5[%c0_52, %c0_53, %c0_54] : memref<1x64x128xf32, #tpu.memory_space<vmem>>, vector<1x64x128xf32>
    %62 = vector.shape_cast %61 : vector<1x64x128xf32> to vector<64x128xf32>
    %63 = vector.shape_cast %60 : vector<64x128xf32> to vector<1x64x128xf32>
    tpu.vector_store %arg5[%c0_52, %c0_53, %c0_54], %63 {strides = array<i32>} : memref<1x64x128xf32, #tpu.memory_space<vmem>>, vector<1x64x128xf32>,
    return
  }
  func.func @transform_0(%arg0: i32, %arg1: i32) -> (i32, i32, i32, i32) {
    %c0_i32 = arith.constant 0 : i32
    %c0_i32_0 = arith.constant 0 : i32
    %c0_i32_1 = arith.constant 0 : i32
    %c0_i32_2 = arith.constant 0 : i32
    return %arg0, %c0_i32, %c0_i32_0, %c0_i32_1 : i32, i32, i32, i32
  }
  func.func @transform_1(%arg0: i32, %arg1: i32) -> (i32, i32) {
    %c0_i32 = arith.constant 0 : i32
    %c0_i32_0 = arith.constant 0 : i32
    return %c0_i32, %arg1 : i32, i32
  }
  func.func @transform_2(%arg0: i32, %arg1: i32) -> (i32, i32) {
    %c0_i32 = arith.constant 0 : i32
    %c0_i32_0 = arith.constant 0 : i32
    return %c0_i32, %arg1 : i32, i32
  }
  func.func @transform_3(%arg0: i32, %arg1: i32) -> (i32, i32, i32) {
    %c0_i32 = arith.constant 0 : i32
    %c0_i32_0 = arith.constant 0 : i32
    return %arg0, %c0_i32, %arg1 : i32, i32, i32
  }
}

</mosaic_0001>

<bundles_post_ra>
// kernel: leaky_relu_conv2d_forward.1
= control target key start
LH: loop header
LB: loop body
LE: loop exit
PB: predicated region body
PF: predicated region fallthrough
CT: control target
= control target key end

     0   :  { %s2212_s12 = smov 0   ;;  %s2214_s13 = smov 0   ;;  %s2499_s0 = inlined_call_operand.vmem [shape: bf16[2,36,9,8], index: 0, kind: input, shape index: {}]   ;;  %s2500_s1 = inlined_call_operand.vmem [shape: bf16[72,128], index: 1, kind: input, shape index: {}]   ;;  %s2501_s2 = inlined_call_operand.vmem [shape: f32[1,128], index: 2, kind: input, shape index: {}]   ;;  %s2502_s3 = inlined_call_operand.vmem [shape: f32[2,64,128], index: 3, kind: output, shape index: {}]  }
   0x1   :  { %s2216_s14 = smov 0  }
   0x2 LB: > { %s25_s15 = sadd.s32 1, %s2186_s13  ;;  %p1756_p0 = scmp.ge.s32.totalorder %s2190_s14, 1  ;;  %s2190_s14 = sphi %s2216_s14, %s13_s14   ;;  %s2186_s13 = sphi %s2214_s13, %s2506_s13   ;;  %s2182_s12 = sphi %s2212_s12, %s2505_s12  }
   0x3   : > { %p27_p1 = scmp.ge.s32.totalorder %s25_s15, 2  ;;  %p168_p2 = scmp.lt.s32.totalorder %s2190_s14, 3 }
   0x5   : > { %s2508_s15 = smov (%p27_p1, %s25_s15), 0  ;;  %p169_p3 = pnand %p1756_p0, %p168_p2 }
   0x6   : > { %v241_v0 = vld [vmem:[%s2500_s1 + $0x4] sm:$0xf] (!%p169_p3)  ;;  %vm275_vm0 = vcmask (!%p169_p3), 1043456   ;;  %v2236_v1 = vld [vmem:[%s2500_s1 + $0x10] sm:$0xf] (!%p169_p3)  ;;  %p202_p4 = scmp.lt.s32.totalorder (!%p169_p3), %s2182_s12, 1 }
   0x7   : > { %172 = sbr.rel (%p169_p3) target bundleno = 319 (0x13f), region = 32  ;;  %2109 = vmatprep.subr.msk.bf16.mxu1 (!%p169_p3), %vm275_vm0, %v241_v0  ;;  %2113 = vmatprep.subr.msk.bf16.mxu0 (!%p169_p3), %vm275_vm0, %v2236_v1  ;;  %v277_v2 = vsel (!%p169_p3), %vm275_vm0, %v241_v0, 0  ;;  %v2244_v3 = vsel (!%p169_p3), %vm275_vm0, %v2236_v1, 0  ;;  %v231_v4 = vld [vmem:[%s2500_s1] sm:$0xf] (!%p169_p3)  ;;  %vm262_vm1 = vcmask (!%p169_p3), 64512  }
   0x8   : > { %1954 = vmatpush3.bf16.msra.mxu1 (!%p169_p3), %v277_v2  ;;  %1994 = vmatpush3.bf16.msra.mxu0 (!%p169_p3), %v2244_v3  ;;  %v1040_v5 = vld [vmem:[%s2500_s1 + $0x14] sm:$0xf] (!%p169_p3)  ;;  %v377_v6 = vsel (!%p169_p3), %vm275_vm0, %v231_v4, 0  ;;  %v1150_v9 = vld [vmem:[%s2500_s1 + $0x18] sm:$0xf] (!%p169_p3) }
   0x9   : > { %2110 = vmatprep.subr.msk.bf16.mxu1 (!%p169_p3), %vm275_vm0, %v231_v4  ;;  %2115 = vmatprep.subr.msk.bf16.mxu0 (!%p169_p3), %vm275_vm0, %v1040_v5  ;;  %v1066_v7 = vsel (!%p169_p3), %vm275_vm0, %v1040_v5, 0  ;;  %v575_v10 = vld [vmem:[%s2500_s1 + $0x8] sm:$0xf] (!%p169_p3)  ;;  %vm460_vm2 = vsmask.f32 (!%p169_p3), 3328  ;;  %v2281_v15 = vsel (!%p169_p3), %vm275_vm0, %v1150_v9, 0 }
   0xa   : > { %vm461_vm3 = vsmask.f32 (!%p169_p3), 7440  ;;  %v2284_v16 = vsel (!%p169_p3), %vm275_vm0, %v575_v10, 0 }
   0xb   : > { %vm2301_vm4 = vmor (!%p169_p3), %vm460_vm2, %vm461_vm3 }
   0xe   : > { %s2510_s12 = smov (!%p202_p4, %s2182_s12), 1 }
   0xf   : > { %s2119_s24 = smul.u32 288, %s2510_s12  ;;  %s1907_s17 = sshll.u32 %s2510_s12, 6 }
  0x10   : > { %s2480_s20 = scalar_lea.vmem %s2502_s3, %s1907_s17 }
  0x11   : > { %s2261_s27 = scalar_lea.vmem %s2499_s0, %s2119_s24 }
  0x12   : > { %v2144_v8 = vld [vmem:[%s2261_s27 + $0x48] ss:$8 sps:$4 sm:$0xff]   ;;  %v2145_v11 = vld [vmem:[%s2261_s27 + $0xd8] ss:$8 sps:$4 sm:$0xff]   ;;  %v1825_v19 = vld [vmem:[%s2261_s27 + $0x94] sm:$0x1] }
  0x13   : > { %1955 = vmatprep.mubr.msk.bf16.mxu1 %vm262_vm1, %v2144_v8  ;;  %v2146_v12 = vld [vmem:[%s2261_s27 + $0x58] ss:$8 sps:$4 sm:$0xff]   ;;  %1995 = vmatprep.mubr.msk.bf16.mxu0 %vm262_vm1, %v2145_v11  ;;  %v2147_v13 = vld [vmem:[%s2261_s27 + $0xe8] ss:$8 sps:$4 sm:$0xff]   ;;  %v1827_v21 = vld [vmem:[%s2261_s27 + $0x9c] sm:$0x1] }
  0x14   : > { %1956 = vmatmul.mubr.msk.bf16.vlgmr.msra.gmra.mrb[0].mxu1 %vm262_vm1, %v2146_v12  ;;  %v2148_v14 = vld [vmem:[%s2261_s27 + $0x68] ss:$8 sps:$4 sm:$0xff]   ;;  %1996 = vmatmul.mubr.msk.bf16.vlgmr.msra.gmra.mrb[0].mxu0 %vm262_vm1, %v2147_v13  ;;  %v2149_v17 = vld [vmem:[%s2261_s27 + $0x78] ss:$8 sps:$4 sm:$0xff]   ;;  %v938_v24 = vshll.u32 %v1825_v19, 16  ;;  %v952_v27 = vshll.u32 %v1827_v21, 16 }
  0x15   : > { %1964 = vmatpush3.bf16.msra.mxu1 %v377_v6  ;;  %2004 = vmatpush3.bf16.msra.mxu0 %v1066_v7  ;;  %v1824_v18 = vld [vmem:[%s2261_s27 + $0x90] sm:$0xf]  ;;  %v1826_v20 = vld [vmem:[%s2261_s27 + $0x98] sm:$0xf]  ;;  %v1828_v28 = vld [vmem:[%s2261_s27 + $0xa0] sm:$0xf] }
  0x16   : > { %1959 = vmatprep.mubr.msk.bf16.mxu1 %vm262_vm1, %v2148_v14  ;;  %v929_v22 = vshrl.u32 %v1824_v18, 16  ;;  %v932_v23 = vshll.u32 %v1824_v18, 16  ;;  %v943_v25 = vshrl.u32 %v1826_v20, 16  ;;  %2116 = vmatprep.subr.msk.bf16.mxu0 %vm275_vm0, %v1150_v9  ;;  %v946_v26 = vshll.u32 %v1826_v20, 16  ;;  %v1829_v29 = vld [vmem:[%s2261_s27 + $0xa4] sm:$0x1] }
  0x17   : > { %2111 = vmatprep.subr.msk.bf16.mxu1 %vm275_vm0, %v575_v10  ;;  %v940_v32 = vrot.slane %v938_v24, 5  ;;  %v1830_v34 = vld [vmem:[%s2261_s27 + $0xa8] sm:$0xf]  ;;  %v954_v36 = vrot.slane %v952_v27, 5  ;;  %v1831_v37 = vld [vmem:[%s2261_s27 + $0xac] sm:$0x1] }
  0x18   : > { %v931_v30 = vrot.slane %v929_v22, 4  ;;  %v934_v31 = vrot.slane %v932_v23, 5  ;;  %v945_v33 = vrot.slane %v943_v25, 4  ;;  %v948_v35 = vrot.slane %v946_v26, 5  ;;  %v2150_v53 = vld [vmem:[%s2261_s27] ss:$8 sps:$4 sm:$0xff]  }
  0x19   : > { %v957_v38 = vshrl.u32 %v1828_v28, 16  ;;  %v960_v39 = vshll.u32 %v1828_v28, 16  ;;  %v966_v41 = vshll.u32 %v1829_v29, 16  ;;  %v971_v42 = vshrl.u32 %v1830_v34, 16  ;;  %v2151_v59 = vld [vmem:[%s2261_s27 + $0x10] ss:$8 sps:$4 sm:$0xff]  }
  0x1a   : > { %v935_v40 = vor.u32 %v934_v31, %v931_v30  ;;  %v974_v43 = vshll.u32 %v1830_v34, 16  ;;  %v949_v45 = vor.u32 %v948_v35, %v945_v33  ;;  %v980_v48 = vshll.u32 %v1831_v37, 16  ;;  %v1832_v60 = vld [vmem:[%s2261_s27 + $0xb0] sm:$0xf]  ;;  %v1833_v61 = vld [vmem:[%s2261_s27 + $0xb4] sm:$0x1] }
  0x1b   : > { %v959_v46 = vrot.slane %v957_v38, 4  ;;  %v962_v47 = vrot.slane %v960_v39, 5  ;;  %v968_v50 = vrot.slane %v966_v41, 5  ;;  %v973_v51 = vrot.slane %v971_v42, 4  ;;  %v1834_v0 = vld [vmem:[%s2261_s27 + $0xb8] sm:$0xf] }
  0x1c   : > { %1960 = vmatmul.mubr.msk.bf16.gmra.mrb[4].mxu1 %vm262_vm1, %v2149_v17  ;;  %v936_v49 = vrot.slane %v935_v40, 4  ;;  %v976_v52 = vrot.slane %v974_v43, 5  ;;  %v950_v54 = vrot.slane %v949_v45, 4  ;;  %v982_v56 = vrot.slane %v980_v48, 5  ;;  %v1835_v2 = vld [vmem:[%s2261_s27 + $0xbc] sm:$0x1] }
  0x1d   : > { %v963_v55 = vor.u32 %v962_v47, %v959_v46  ;;  %1965 = vmatprep.mubr.msk.bf16.mxu1 %vm262_vm1, %v2150_v53  ;;  %v985_v4 = vshrl.u32 %v1832_v60, 16  ;;  %v988_v7 = vshll.u32 %v1832_v60, 16  ;;  %v994_v8 = vshll.u32 %v1833_v61, 16  ;;  %v1836_v9 = vld [vmem:[%s2261_s27 + $0xc0] sm:$0xf] }
  0x1e   : > { %v941_v57 = vsel %vm2301_vm4, %v936_v49, %v940_v32  ;;  %v977_v58 = vor.u32 %v976_v52, %v973_v51  ;;  %v955_v62 = vsel %vm2301_vm4, %v950_v54, %v954_v36  ;;  %v2320_v10 = vld [vmem:[%s2500_s1 + $0xc] sm:$0xf]  ;;  %v999_v13 = vshrl.u32 %v1834_v0, 16  ;;  %v1837_v17 = vld [vmem:[%s2261_s27 + $0xc4] sm:$0x1] }
  0x1f   : > { %v964_v63 = vrot.slane %v963_v55, 4  ;;  %v1840_v5 = vcombine.low %v941_v57, %v955_v62  ;;  %v987_v12 = vrot.slane %v985_v4, 4  ;;  %v1002_v14 = vshll.u32 %v1834_v0, 16  ;;  %v1838_v22 = vld [vmem:[%s2261_s27 + $0xc8] sm:$0xf] }
  0x20   : > { %v978_v6 = vrot.slane %v977_v58, 4  ;;  %v990_v19 = vrot.slane %v988_v7, 5  ;;  %v996_v20 = vrot.slane %v994_v8, 5  ;;  %v1008_v21 = vshll.u32 %v1835_v2, 16  ;;  %v2332_v23 = vld [vmem:[%s2500_s1 + $0x1c] sm:$0xf] }
  0x21   : > { %v969_v11 = vsel %vm2301_vm4, %v964_v63, %v968_v50  ;;  %2005 = vmatprep.mubr.msk.bf16.mxu0 %vm262_vm1, %v1840_v5  ;;  %v1001_v25 = vrot.slane %v999_v13, 4  ;;  %v1004_v26 = vrot.slane %v1002_v14, 5  ;;  %v1839_v27 = vld [vmem:[%s2261_s27 + $0xcc] sm:$0x1]  ;;  %v1013_v28 = vshrl.u32 %v1836_v9, 16 }
  0x22   : > { %v983_v18 = vsel %vm2301_vm4, %v978_v6, %v982_v56  ;;  %v991_v29 = vor.u32 %v990_v19, %v987_v12  ;;  %v1010_v30 = vrot.slane %v1008_v21, 5  ;;  %v1016_v31 = vshll.u32 %v1836_v9, 16  ;;  %v2154_v53 = vld [vmem:[%s2261_s27 + $0x8] ss:$8 sps:$4 sm:$0xff]   ;;  %v444_v54 = vld [vmem:[%s2261_s27] sm:$0xf] }
  0x23   : > { %v1841_v24 = vcombine.low %v969_v11, %v983_v18  ;;  %v1022_v32 = vshll.u32 %v1837_v17, 16  ;;  %v1005_v33 = vor.u32 %v1004_v26, %v1001_v25  ;;  %v1015_v34 = vrot.slane %v1013_v28, 4  ;;  %v445_v56 = vld [vmem:[%s2261_s27 + $0x4] sm:$0x1]  ;;  %v446_v57 = vld [vmem:[%s2261_s27 + $0x8] sm:$0xf] }
  0x24   : > { %1966 = vmatmul.mubr.msk.bf16.vlgmr.msra.gmra.mrb[0].mxu1 %vm262_vm1, %v2151_v59  ;;  %v1027_v35 = vshrl.u32 %v1838_v22, 16  ;;  %v1030_v36 = vshll.u32 %v1838_v22, 16  ;;  %v992_v37 = vrot.slane %v991_v29, 4  ;;  %v1018_v38 = vrot.slane %v1016_v31, 5  ;;  %v447_v58 = vld [vmem:[%s2261_s27 + $0xc] sm:$0x1] }
  0x25   : > { %1974 = vmatpush3.bf16.msra.mxu1 %v2284_v16  ;;  %2006 = vmatmul.mubr.msk.bf16.vlgmr.msra.gmra.mrb[0].mxu0 %vm262_vm1, %v1841_v24  ;;  %v1036_v39 = vshll.u32 %v1839_v27, 16  ;;  %v2152_v16 = vld [vmem:[%s2261_s27 + $0x20] ss:$8 sps:$4 sm:$0xff]   ;;  %v1006_v40 = vrot.slane %v1005_v33, 4  ;;  %v1024_v46 = vrot.slane %v1022_v32, 5  ;;  %v464_v60 = vshrl.u32 %v444_v54, 16 }
  0x26   : > { %2112 = vmatprep.subr.msk.bf16.mxu1 %vm275_vm0, %v2320_v10  ;;  %2014 = vmatpush3.bf16.msra.mxu0 %v2281_v15  ;;  %v1029_v41 = vrot.slane %v1027_v35, 4  ;;  %v1032_v42 = vrot.slane %v1030_v36, 5  ;;  %v997_v43 = vsel %vm2301_vm4, %v992_v37, %v996_v20  ;;  %v1019_v45 = vor.u32 %v1018_v38, %v1015_v34  ;;  %v2153_v15 = vld [vmem:[%s2261_s27 + $0x30] ss:$8 sps:$4 sm:$0xff]   ;;  %v449_v6 = vld [vmem:[%s2261_s27 + $0x14] sm:$0x1] }
  0x27   : > { %2117 = vmatprep.subr.msk.bf16.mxu0 %vm275_vm0, %v2332_v23  ;;  %1969 = vmatprep.mubr.msk.bf16.mxu1 %vm262_vm1, %v2152_v16  ;;  %v1011_v47 = vsel %vm2301_vm4, %v1006_v40, %v1010_v30  ;;  %v1038_v49 = vrot.slane %v1036_v39, 5  ;;  %v467_v61 = vshll.u32 %v444_v54, 16  ;;  %v473_v62 = vshll.u32 %v445_v56, 16  ;;  %v448_v63 = vld [vmem:[%s2261_s27 + $0x10] sm:$0xf] }
  0x28   : > { %v1033_v48 = vor.u32 %v1032_v42, %v1029_v41  ;;  %v1842_v50 = vcombine.low %v997_v43, %v1011_v47  ;;  %v1020_v51 = vrot.slane %v1019_v45, 4  ;;  %v478_v2 = vshrl.u32 %v446_v57, 16  ;;  %v450_v11 = vld [vmem:[%s2261_s27 + $0x18] sm:$0xf]  ;;  %v451_v18 = vld [vmem:[%s2261_s27 + $0x1c] sm:$0x1] }
  0x29   : > { %v481_v4 = vshll.u32 %v446_v57, 16  ;;  %v487_v5 = vshll.u32 %v447_v58, 16  ;;  %v466_v7 = vrot.slane %v464_v60, 4  ;;  %v469_v8 = vrot.slane %v467_v61, 5  ;;  %v2155_v29 = vld [vmem:[%s2261_s27 + $0x18] ss:$8 sps:$4 sm:$0xff]  }
  0x2a   : > { %v1034_v52 = vrot.slane %v1033_v48, 4  ;;  %2009 = vmatprep.mubr.msk.bf16.mxu0 %vm262_vm1, %v1842_v50  ;;  %v1025_v55 = vsel %vm2301_vm4, %v1020_v51, %v1024_v46  ;;  %v475_v9 = vrot.slane %v473_v62, 5  ;;  %v492_v12 = vshrl.u32 %v448_v63, 16  ;;  %v2156_v37 = vld [vmem:[%s2261_s27 + $0x28] ss:$8 sps:$4 sm:$0xff]  }
  0x2b   : > { %v480_v13 = vrot.slane %v478_v2, 4  ;;  %v483_v14 = vrot.slane %v481_v4, 5  ;;  %v489_v17 = vrot.slane %v487_v5, 5  ;;  %v495_v19 = vshll.u32 %v448_v63, 16  ;;  %v452_v40 = vld [vmem:[%s2261_s27 + $0x20] sm:$0xf] }
  0x2c   : > { %1970 = vmatmul.mubr.msk.bf16.gmra.mrb[4].mxu1 %vm262_vm1, %v2153_v15  ;;  %v1039_v59 = vsel %vm2301_vm4, %v1034_v52, %v1038_v49  ;;  %v470_v20 = vor.u32 %v469_v8, %v466_v7  ;;  %v494_v21 = vrot.slane %v492_v12, 4  ;;  %v501_v22 = vshll.u32 %v449_v6, 16  ;;  %v453_v45 = vld [vmem:[%s2261_s27 + $0x24] sm:$0x1]  ;;  %v454_v46 = vld [vmem:[%s2261_s27 + $0x28] sm:$0xf] }
  0x2d   : > { %v1843_v0 = vcombine.low %v1025_v55, %v1039_v59  ;;  %v506_v24 = vshrl.u32 %v450_v11, 16  ;;  %v484_v25 = vor.u32 %v483_v14, %v480_v13  ;;  %v497_v26 = vrot.slane %v495_v19, 5  ;;  %v455_v48 = vld [vmem:[%s2261_s27 + $0x2c] sm:$0x1]  ;;  %v456_v55 = vld [vmem:[%s2261_s27 + $0x30] sm:$0xf] }
  0x2e   : > { %v509_v27 = vshll.u32 %v450_v11, 16  ;;  %v515_v28 = vshll.u32 %v451_v18, 16  ;;  %v1302_v30 = vsel %vm275_vm0, %v2332_v23, 0  ;;  %v471_v31 = vrot.slane %v470_v20, 4  ;;  %v2379_v23 = vld [vmem:[%s2500_s1 + $0x20] sm:$0xf] }
  0x2f   : > { %2010 = vmatmul.mubr.msk.bf16.gmra.mrb[4].mxu0 %vm262_vm1, %v1843_v0  ;;  %v503_v32 = vrot.slane %v501_v22, 5  ;;  %v508_v33 = vrot.slane %v506_v24, 4  ;;  %v485_v34 = vrot.slane %v484_v25, 4  ;;  %v498_v35 = vor.u32 %v497_v26, %v494_v21  ;;  %v457_v60 = vld [vmem:[%s2261_s27 + $0x34] sm:$0x1] }
  0x30   : > { %2015 = vmatprep.mubr.msk.bf16.mxu0 %vm262_vm1, %v2154_v53  ;;  %v511_v36 = vrot.slane %v509_v27, 5  ;;  %v476_v38 = vsel %vm2301_vm4, %v471_v31, %v475_v9  ;;  %v517_v39 = vrot.slane %v515_v28, 5  ;;  %v719_v16 = vsel %vm275_vm0, %v2320_v10, 0  ;;  %v2157_v62 = vld [vmem:[%s2261_s27 + $0x38] ss:$8 sps:$4 sm:$0xff]  }
  0x31   : > { %v490_v41 = vsel %vm2301_vm4, %v485_v34, %v489_v17  ;;  %v499_v42 = vrot.slane %v498_v35, 4  ;;  %v520_v15 = vshrl.u32 %v452_v40, 16  ;;  %v523_v49 = vshll.u32 %v452_v40, 16  ;;  %v458_v0 = vld [vmem:[%s2261_s27 + $0x38] sm:$0xf] }
  0x32   : > { %v512_v43 = vor.u32 %v511_v36, %v508_v33  ;;  %v1784_v47 = vcombine.low %v476_v38, %v490_v41  ;;  %v529_v10 = vshll.u32 %v453_v45, 16  ;;  %v534_v50 = vshrl.u32 %v454_v46, 16  ;;  %v459_v2 = vld [vmem:[%s2261_s27 + $0x3c] sm:$0x1]  ;;  %v2158_v14 = vld [vmem:[%s2261_s27 + $0x50] ss:$8 sps:$4 sm:$0xff]  }
  0x33   : > { %v504_v51 = vsel %vm2301_vm4, %v499_v42, %v503_v32  ;;  %v522_v53 = vrot.slane %v520_v15, 4  ;;  %v537_v54 = vshll.u32 %v454_v46, 16  ;;  %v525_v56 = vrot.slane %v523_v49, 5  ;;  %v2159_v35 = vld [vmem:[%s2261_s27 + $0x60] ss:$8 sps:$4 sm:$0xff]  }
  0x34   : > { %v513_v52 = vrot.slane %v512_v43, 4  ;;  %1975 = vmatprep.mubr.msk.bf16.mxu1 %vm262_vm1, %v1784_v47  ;;  %v531_v57 = vrot.slane %v529_v10, 5  ;;  %v536_v58 = vrot.slane %v534_v50, 4  ;;  %v543_v59 = vshll.u32 %v455_v48, 16  ;;  %v1881_v40 = vld [vmem:[%s2261_s27 + $0xc] sm:$0x1] }
  0x35   : > { %v539_v63 = vrot.slane %v537_v54, 5  ;;  %v548_v4 = vshrl.u32 %v456_v55, 16  ;;  %v526_v6 = vor.u32 %v525_v56, %v522_v53  ;;  %v551_v8 = vshll.u32 %v456_v55, 16  ;;  %v1882_v41 = vld [vmem:[%s2261_s27 + $0x10] sm:$0xf] }
  0x36   : > { %v518_v61 = vsel %vm2301_vm4, %v513_v52, %v517_v39  ;;  %v545_v7 = vrot.slane %v543_v59, 5  ;;  %v557_v12 = vshll.u32 %v457_v60, 16  ;;  %v562_v13 = vshrl.u32 %v458_v0, 16  ;;  %v2162_v39 = vld [vmem:[%s2261_s27 + $0x70] ss:$8 sps:$4 sm:$0xff]  }
  0x37   : > { %2016 = vmatmul.mubr.msk.bf16.vlgmr.msra.gmra.mrb[0].mxu0 %vm262_vm1, %v2155_v29  ;;  %v1785_v5 = vcombine.low %v504_v51, %v518_v61  ;;  %v540_v9 = vor.u32 %v539_v63, %v536_v58  ;;  %v550_v11 = vrot.slane %v548_v4, 4  ;;  %v527_v17 = vrot.slane %v526_v6, 4  ;;  %v1883_v42 = vld [vmem:[%s2261_s27 + $0x14] sm:$0x1]  ;;  %v1884_v48 = vld [vmem:[%s2261_s27 + $0x18] sm:$0xf] }
  0x38   : > { %2024 = vmatpush3.bf16.msra.mxu0 %v1302_v30  ;;  %2019 = vmatprep.mubr.msk.bf16.mxu0 %vm262_vm1, %v2156_v37  ;;  %v553_v18 = vrot.slane %v551_v8, 5  ;;  %v565_v19 = vshll.u32 %v458_v0, 16  ;;  %v571_v20 = vshll.u32 %v459_v2, 16  ;;  %v564_v22 = vrot.slane %v562_v13, 4  ;;  %v2160_v37 = vld [vmem:[%s2261_s27 + $0x90] ss:$8 sps:$4 sm:$0xff]  }
  0x39   : > { %2118 = vmatprep.subr.msk.bf16.mxu0 %vm275_vm0, %v2379_v23  ;;  %1976 = vmatmul.mubr.msk.bf16.vlgmr.msra.gmra.mrb[0].mxu1 %vm262_vm1, %v1785_v5  ;;  %v541_v21 = vrot.slane %v540_v9, 4  ;;  %v532_v24 = vsel %vm2301_vm4, %v527_v17, %v531_v57  ;;  %v559_v26 = vrot.slane %v557_v12, 5  ;;  %v1531_v34 = vsel %vm275_vm0, %v2379_v23, 0  ;;  %v1885_v50 = vld [vmem:[%s2261_s27 + $0x1c] sm:$0x1] }
  0x3a   : > { %1984 = vmatpush3.bf16.msra.mxu1 %v719_v16  ;;  %v554_v25 = vor.u32 %v553_v18, %v550_v11  ;;  %v567_v27 = vrot.slane %v565_v19, 5  ;;  %v573_v32 = vrot.slane %v571_v20, 5  ;;  %v1880_v16 = vld [vmem:[%s2261_s27 + $0x8] sm:$0xf]  ;;  %v1403_v23 = vshll.u32 %v1881_v40, 16 }
  0x3b   : > { %2114 = vmatprep.subr.msk.bf16.mxu1 %vm275_vm0, %v2236_v1  ;;  %v546_v28 = vsel %vm2301_vm4, %v541_v21, %v545_v7  ;;  %v1394_v43 = vshrl.u32 %v1880_v16, 16  ;;  %v1397_v45 = vshll.u32 %v1880_v16, 16  ;;  %v1408_v46 = vshrl.u32 %v1882_v41, 16  ;;  %v1886_v51 = vld [vmem:[%s2261_s27 + $0x20] sm:$0xf] }
  0x3c   : > { %v1786_v29 = vcombine.low %v532_v24, %v546_v28  ;;  %v555_v30 = vrot.slane %v554_v25, 4  ;;  %v568_v31 = vor.u32 %v567_v27, %v564_v22  ;;  %v1411_v15 = vshll.u32 %v1882_v41, 16  ;;  %v2161_v52 = vld [vmem:[%s2261_s27 + $0xa0] ss:$8 sps:$4 sm:$0xff]   ;;  %v1887_v58 = vld [vmem:[%s2261_s27 + $0x24] sm:$0x1] }
  0x3d   : > { %v1417_v47 = vshll.u32 %v1883_v42, 16  ;;  %v1396_v49 = vrot.slane %v1394_v43, 4  ;;  %v1399_v10 = vrot.slane %v1397_v45, 5  ;;  %v2163_v53 = vld [vmem:[%s2261_s27 + $0x80] ss:$8 sps:$4 sm:$0xff]   ;;  %v1405_v54 = vrot.slane %v1403_v23, 5 }
  0x3e   : > { %1979 = vmatprep.mubr.msk.bf16.mxu1 %vm262_vm1, %v1786_v29  ;;  %v560_v1 = vsel %vm2301_vm4, %v555_v30, %v559_v26  ;;  %v569_v33 = vrot.slane %v568_v31, 4  ;;  %v1410_v55 = vrot.slane %v1408_v46, 4  ;;  %v1413_v56 = vrot.slane %v1411_v15, 5  ;;  %v2164_v5 = vld [vmem:[%s2261_s27 + $0xb0] ss:$8 sps:$4 sm:$0xff]  }
  0x3f   : > { %2020 = vmatmul.mubr.msk.bf16.gmra.mrb[4].mxu0 %vm262_vm1, %v2157_v62  ;;  %v1419_v57 = vrot.slane %v1417_v47, 5  ;;  %v1400_v59 = vor.u32 %v1399_v10, %v1396_v49  ;;  %v1422_v60 = vshrl.u32 %v1884_v48, 16  ;;  %v1425_v61 = vshll.u32 %v1884_v48, 16  ;;  %v1888_v17 = vld [vmem:[%s2261_s27 + $0x28] sm:$0xf] }
  0x40   : > { %2025 = vmatprep.mubr.msk.bf16.mxu0 %vm262_vm1, %v2158_v14  ;;  %v574_v36 = vsel %vm2301_vm4, %v569_v33, %v573_v32  ;;  %v1431_v62 = vshll.u32 %v1885_v50, 16  ;;  %v1414_v63 = vor.u32 %v1413_v56, %v1410_v55  ;;  %v1436_v0 = vshrl.u32 %v1886_v51, 16  ;;  %v1889_v20 = vld [vmem:[%s2261_s27 + $0x2c] sm:$0x1]  ;;  %v1890_v21 = vld [vmem:[%s2261_s27 + $0x30] sm:$0xf] }
  0x41   : > { %v1787_v38 = vcombine.low %v560_v1, %v574_v36  ;;  %v1439_v2 = vshll.u32 %v1886_v51, 16  ;;  %v1445_v4 = vshll.u32 %v1887_v58, 16  ;;  %v1401_v6 = vrot.slane %v1400_v59, 4  ;;  %v1891_v22 = vld [vmem:[%s2261_s27 + $0x34] sm:$0x1] }
  0x42   : > { %v1424_v7 = vrot.slane %v1422_v60, 4  ;;  %v1427_v8 = vrot.slane %v1425_v61, 5  ;;  %v1433_v9 = vrot.slane %v1431_v62, 5  ;;  %v1415_v11 = vrot.slane %v1414_v63, 4  ;;  %v2165_v32 = vld [vmem:[%s2261_s27 + $0xc0] ss:$8 sps:$4 sm:$0xff]  }
  0x43   : > { %1980 = vmatmul.mubr.msk.bf16.gmra.mrb[4].mxu1 %vm262_vm1, %v1787_v38  ;;  %v1438_v12 = vrot.slane %v1436_v0, 4  ;;  %v1441_v13 = vrot.slane %v1439_v2, 5  ;;  %v1447_v14 = vrot.slane %v1445_v4, 5  ;;  %v1406_v18 = vsel %vm2301_vm4, %v1401_v6, %v1405_v54  ;;  %v1892_v36 = vld [vmem:[%s2261_s27 + $0x38] sm:$0xf] }
  0x44   : > { %1985 = vmatprep.mubr.msk.bf16.mxu1 %vm262_vm1, %v2160_v37  ;;  %v1428_v19 = vor.u32 %v1427_v8, %v1424_v7  ;;  %v1420_v24 = vsel %vm2301_vm4, %v1415_v11, %v1419_v57  ;;  %v1450_v26 = vshrl.u32 %v1888_v17, 16  ;;  %v1453_v27 = vshll.u32 %v1888_v17, 16  ;;  %v1893_v16 = vld [vmem:[%s2261_s27 + $0x3c] sm:$0x1]  ;;  %v1894_v43 = vld [vmem:[%s2261_s27 + $0x40] sm:$0xf] }
  0x45   : > { %v1442_v25 = vor.u32 %v1441_v13, %v1438_v12  ;;  %v1896_v28 = vcombine.low %v1406_v18, %v1420_v24  ;;  %v1459_v30 = vshll.u32 %v1889_v20, 16  ;;  %v1464_v31 = vshrl.u32 %v1890_v21, 16  ;;  %v1895_v45 = vld [vmem:[%s2261_s27 + $0x44] sm:$0x1]  ;;  %v2166_v15 = vld [vmem:[%s2261_s27 + $0xf8] ss:$8 sps:$4 sm:$0xff]  }
  0x46   : > { %v1429_v29 = vrot.slane %v1428_v19, 4  ;;  %v1452_v33 = vrot.slane %v1450_v26, 4  ;;  %v1478_v23 = vshrl.u32 %v1892_v36, 16  ;;  %v1481_v48 = vshll.u32 %v1892_v36, 16  ;;  %v2167_v8 = vld [vmem:[%s2261_s27 + $0x108] ss:$8 sps:$4 sm:$0xff]  }
  0x47   : > { %2026 = vmatmul.mubr.msk.bf16.vlgmr.msra.gmra.mrb[0].mxu0 %vm262_vm1, %v2159_v35  ;;  %v1443_v1 = vrot.slane %v1442_v25, 4  ;;  %v1467_v35 = vshll.u32 %v1890_v21, 16  ;;  %v1461_v37 = vrot.slane %v1459_v30, 5  ;;  %v1466_v38 = vrot.slane %v1464_v31, 4  ;;  %v1904_v18 = vld [vmem:[%s2501_s2] ss:$0 sm:$0xff] }
  0x48   : > { %2034 = vmatpush3.bf16.msra.mxu0 %v1531_v34  ;;  %2029 = vmatprep.mubr.msk.bf16.mxu0 %vm262_vm1, %v2162_v39  ;;  %v1455_v34 = vrot.slane %v1453_v27, 5  ;;  %v1473_v39 = vshll.u32 %v1891_v22, 16  ;;  %v1487_v49 = vshll.u32 %v1893_v16, 16  ;;  %v1480_v51 = vrot.slane %v1478_v23, 4 }
  0x49   : > { %v1448_v40 = vsel %vm2301_vm4, %v1443_v1, %v1447_v14  ;;  %v1469_v42 = vrot.slane %v1467_v35, 5  ;;  %v1495_v54 = vshll.u32 %v1894_v43, 16  ;;  %v1501_v55 = vshll.u32 %v1895_v45, 16 }
  0x4a   : > { %v1456_v41 = vor.u32 %v1455_v34, %v1452_v33  ;;  %v1475_v47 = vrot.slane %v1473_v39, 5  ;;  %v1489_v60 = vrot.slane %v1487_v49, 5 }
  0x4b   : > { %1986 = vmatmul.mubr.msk.bf16.vlgmr.msra.gmra.mrb[0].mxu1 %vm262_vm1, %v2161_v52  ;;  %v1470_v50 = vor.u32 %v1469_v42, %v1466_v38  ;;  %v1492_v52 = vshrl.u32 %v1894_v43, 16  ;;  %v1497_v61 = vrot.slane %v1495_v54, 5  ;;  %v1503_v4 = vrot.slane %v1501_v55, 5 }
  0x4c   : > { %2044 = vmatpush3.bf16.msra.mxu1 %v2244_v3  ;;  %1989 = vmatprep.mubr.msk.bf16.mxu1 %vm262_vm1, %v2164_v5  ;;  %v1434_v3 = vsel %vm2301_vm4, %v1429_v29, %v1433_v9  ;;  %v1457_v10 = vrot.slane %v1456_v41, 4 }
  0x4d   : > { %v1897_v46 = vcombine.low %v1434_v3, %v1448_v40  ;;  %v1471_v57 = vrot.slane %v1470_v50, 4  ;;  %v1494_v58 = vrot.slane %v1492_v52, 4 }
  0x4e   : > { %v1462_v56 = vsel %vm2301_vm4, %v1457_v10, %v1461_v37 }
  0x4f   : > { %2030 = vmatmul.mubr.msk.bf16.gmra.mrb[4].mxu0 %vm262_vm1, %v2163_v53  ;;  %v1483_v53 = vrot.slane %v1481_v48, 5  ;;  %v1476_v62 = vsel %vm2301_vm4, %v1471_v57, %v1475_v47  ;;  %v1498_v2 = vor.u32 %v1497_v61, %v1494_v58 }
  0x50   : > { %2035 = vmatprep.mubr.msk.bf16.mxu0 %vm262_vm1, %v1896_v28  ;;  %v1898_v63 = vcombine.low %v1462_v56, %v1476_v62 }
  0x51   : > { %v1484_v59 = vor.u32 %v1483_v53, %v1480_v51  ;;  %v1499_v6 = vrot.slane %v1498_v2, 4 }
  0x53   : > { %1990 = vmatmul.mubr.msk.bf16.gmra.mrb[4].mxu1 %vm262_vm1, %v2165_v32  ;;  %v1485_v0 = vrot.slane %v1484_v59, 4  ;;  %v1504_v7 = vsel %vm2301_vm4, %v1499_v6, %v1503_v4 }
  0x54   : > { %1999 = vmatprep.mubr.msk.bf16.mxu1 %vm262_vm1, %v2166_v15 }
  0x55   : > { %v1490_v5 = vsel %vm2301_vm4, %v1485_v0, %v1489_v60 }
  0x56   : > { %v1899_v9 = vcombine.low %v1490_v5, %v1504_v7 }
  0x57   : > { %2036 = vmatmul.mubr.msk.bf16.vlgmr.msra.gmra.mrb[0].mxu0 %vm262_vm1, %v1897_v46 }
  0x58   : > { %2039 = vmatprep.mubr.msk.bf16.mxu0 %vm262_vm1, %v1898_v63 }
  0x5f   : > { %2040 = vmatmul.mubr.msk.bf16.gmra.mrb[4].mxu0 %vm262_vm1, %v1899_v9  ;;  %2000 = vmatmul.mubr.msk.bf16.vlgmr.msra.gmra.mrb[4].mxu1 %vm262_vm1, %v2167_v8 }
 0x11e   : > { %v1987_v11 = vpop.f32.mrb[0].mxu1 }
 0x11f   : > { %v755_v12 = vpop.f32.mrb[1].mxu1 }
 0x120   : > { %v1988_v13 = vpop.f32.mrb[2].mxu1 }
 0x121   : > { %v758_v14 = vpop.f32.mrb[3].mxu1 }
 0x12a   : > { %v2037_v17 = vpop.f32.mrb[0].mxu0 }
 0x12b   : > { %v2045_v19 = vadd.f32 %v2037_v17, %v1987_v11  ;;  %v1567_v20 = vpop.f32.mrb[1].mxu0 }
 0x12c   : > { %v2046_v44 = vadd.f32 %v1567_v20, %v755_v12  ;;  %v2038_v21 = vpop.f32.mrb[2].mxu0 }
 0x12d   : > { %v1615_v22 = vadd.f32 %v2045_v19, %v1904_v18  ;;  %v2047_v24 = vadd.f32 %v2038_v21, %v1988_v13  ;;  %v1570_v25 = vpop.f32.mrb[3].mxu0 }
 0x12e   : > { %v1613_v26 = vadd.f32 %v2046_v44, %v1904_v18  ;;  %v2048_v27 = vadd.f32 %v1570_v25, %v758_v14 }
 0x12f   : > { %v1623_v28 = vmul.f32 0.01, %v1615_v22  ;;  %v1616_v29 = vadd.f32 %v2047_v24, %v1904_v18 }
 0x130   : > { %v1621_v30 = vmul.f32 0.01, %v1613_v26  ;;  %v1614_v31 = vadd.f32 %v2048_v27, %v1904_v18 }
 0x131   : > { %v1631_v32 = vmax.f32 %v1615_v22, %v1623_v28  ;;  %v1624_v1 = vmul.f32 0.01, %v1616_v29 }
 0x132   : > { %v1629_v33 = vmax.f32 %v1613_v26, %v1621_v30  ;;  %v1622_v34 = vmul.f32 0.01, %v1614_v31  ;;  %v2041_v3 = vpop.f32.mrb[4].mxu0  ;;  %v2001_v38 = vpop.f32.mrb[4].mxu1 }
 0x133   : > { %1639 = vst [vmem:[%s2480_s20 + $0x10] sm:$0xff] %v1631_v32  ;;  %v1632_v35 = vmax.f32 %v1616_v29, %v1624_v1  ;;  %v1583_v37 = vpop.f32.mrb[5].mxu0  ;;  %v2049_v16 = vadd.f32 %v2041_v3, %v2001_v38  ;;  %v889_v40 = vpop.f32.mrb[5].mxu1 }
 0x134   : > { %1637 = vst [vmem:[%s2480_s20] sm:$0xff] %v1629_v33  ;;  %v1630_v36 = vmax.f32 %v1614_v31, %v1622_v34  ;;  %v2042_v39 = vpop.f32.mrb[6].mxu0  ;;  %v2050_v42 = vadd.f32 %v1583_v37, %v889_v40  ;;  %v2002_v43 = vpop.f32.mrb[6].mxu1 }
 0x135   : > { %1640 = vst [vmem:[%s2480_s20 + $0x18] sm:$0xff] %v1632_v35  ;;  %v1586_v41 = vpop.f32.mrb[7].mxu0  ;;  %v1619_v45 = vadd.f32 %v2049_v16, %v1904_v18  ;;  %v2051_v23 = vadd.f32 %v2042_v39, %v2002_v43  ;;  %v892_v46 = vpop.f32.mrb[7].mxu1 }
 0x136   : > { %1638 = vst [vmem:[%s2480_s20 + $0x8] sm:$0xff] %v1630_v36  ;;  %v1617_v15 = vadd.f32 %v2050_v42, %v1904_v18  ;;  %v2052_v47 = vadd.f32 %v1586_v41, %v892_v46 }
 0x137   : > { %v1627_v48 = vmul.f32 0.01, %v1619_v45  ;;  %v1620_v49 = vadd.f32 %v2051_v23, %v1904_v18 }
 0x138   : > { %v1625_v10 = vmul.f32 0.01, %v1617_v15  ;;  %v1618_v50 = vadd.f32 %v2052_v47, %v1904_v18 }
 0x139   : > { %v1635_v51 = vmax.f32 %v1619_v45, %v1627_v48  ;;  %v1628_v52 = vmul.f32 0.01, %v1620_v49 }
 0x13a   : > { %v1633_v53 = vmax.f32 %v1617_v15, %v1625_v10  ;;  %v1626_v54 = vmul.f32 0.01, %v1618_v50 }
 0x13b   : > { %1643 = vst [vmem:[%s2480_s20 + $0x30] sm:$0xff] %v1635_v51  ;;  %v1636_v55 = vmax.f32 %v1620_v49, %v1628_v52 }
 0x13c   : > { %1641 = vst [vmem:[%s2480_s20 + $0x20] sm:$0xff] %v1633_v53  ;;  %v1634_v56 = vmax.f32 %v1618_v50, %v1626_v54 }
 0x13d   : > { %1644 = vst [vmem:[%s2480_s20 + $0x38] sm:$0xff] %v1636_v55 }
 0x13e   : > { %1642 = vst [vmem:[%s2480_s20 + $0x28] sm:$0xff] %v1634_v56 }
 0x13f PF: > { %s13_s14 = sadd.s32 1, %s2190_s14   ;;  %s2505_s12 = smov %s2186_s13 }
 0x140   : > { %p10_p5 = scmp.ge.s32.totalorder %s13_s14, 4   ;;  %s2506_s13 = smov %s2508_s15 }
 0x142   :  { %12 = sbr.rel (!%p10_p5) target bundleno = 2 (0x2), region = 73 }

</bundles_post_ra>
